<compile_context>
chip_gen: v7x
topology: tpu7x:2x2x1
jax: 0.10.0
libtpu: 0.0.40
codegen_flags: <defaults>
</compile_context>

<pallas_src>
import functools

import jax
import jax.numpy as jnp
import numpy as np
from jax.experimental import pallas as pl
from jax.experimental.pallas import tpu as pltpu


def _duc_conv_kernel(xa_ref, xb0_ref, xb1_ref, w_ref, scale_ref, bias_ref, o_ref):
    """Fused 3x3 conv (9 shifted matmuls) + folded BN + ReLU for one row block.

    xa_ref:    (1, tile_h, W+2, Cin)  padded rows [i*tile_h, i*tile_h + tile_h)
    xb0_ref:   (1, 1, W+2, Cin)       halo row i*tile_h + tile_h
    xb1_ref:   (1, 1, W+2, Cin)       halo row i*tile_h + tile_h + 1
    w_ref:     (3, 3, Cin, Coutp)     conv weight, HWIO (Cout zero-padded to lanes)
    scale_ref: (1, Coutp)             gamma / sqrt(var + eps)
    bias_ref:  (1, Coutp)             beta - mean * scale
    o_ref:     (1, tile_h, W, Coutp)  conv+bn+relu output block (NHWC)
    """
    tile_h = xa_ref.shape[1]
    cin = xa_ref.shape[3]
    w_out = o_ref.shape[2]
    coutp = o_ref.shape[3]

    # (tile_h + 2, W+2, Cin) halo window for this row block (VMEM resident values).
    xwin = jnp.concatenate([xa_ref[0], xb0_ref[0], xb1_ref[0]], axis=0)
    wk = w_ref[...]  # (3, 3, Cin, Coutp), loaded once per step (resident block)

    acc = jnp.zeros((tile_h * w_out, coutp), dtype=jnp.float32)
    for dy in range(3):
        for dx in range(3):
            patch = xwin[dy:dy + tile_h, dx:dx + w_out, :].reshape(tile_h * w_out, cin)
            acc = acc + jnp.dot(patch, wk[dy, dx],
                                preferred_element_type=jnp.float32)

    y = acc * scale_ref[...] + bias_ref[...]   # folded BatchNorm (eval mode), f32
    y = jnp.maximum(y, 0.0)                    # ReLU, f32
    o_ref[...] = y.reshape(1, tile_h, w_out, coutp).astype(o_ref.dtype)


def _round_up(x, m):
    return (x + m - 1) // m * m


def _choose_tile_h(H, Wp, W, Cin, Coutp, in_itemsize):
    """Largest divisor of H (preferring multiples of 8) whose double-buffered
    working set stays comfortably inside v7x's 64 MiB physical VMEM."""
    budget = 6 * 1024 * 1024
    fitting = []
    for t in range(1, H + 1):
        if H % t:
            continue
        in_bytes = (t + 2) * Wp * Cin * in_itemsize
        out_bytes = t * W * Coutp * 4
        if 2 * (in_bytes + out_bytes) + 2 * out_bytes <= budget:
            fitting.append(t)
    if not fitting:
        return 1
    mult8 = [t for t in fitting if t % 8 == 0]
    return max(mult8) if mult8 else max(fitting)


@functools.partial(jax.jit,
                   static_argnames=("upscale_factor", "tile_h", "compute_dtype"))
def duc_forward(x_nchw, weight_oihw, gamma, beta, running_mean, running_var,
                eps=1e-5, upscale_factor=2, tile_h=None,
                compute_dtype=jnp.bfloat16):
    """DUC forward. x_nchw: (N, Cin, H, W) -> (N, Cout // r^2, H*r, W*r)."""
    N, Cin, H, W = x_nchw.shape
    Cout = weight_oihw.shape[0]
    r = upscale_factor
    assert Cout % (r * r) == 0
    Hp, Wp = H + 2, W + 2
    in_itemsize = jnp.dtype(compute_dtype).itemsize

    # Lane-dense output channels: pad Cout to a multiple of 128 so stores are
    # unmasked vst; padded channels are sliced off after the kernel.
    Coutp = _round_up(Cout, 128)

    if tile_h is None:
        tile_h = _choose_tile_h(H, Wp, W, Cin, Coutp, in_itemsize)
    assert H % tile_h == 0, "tile_h must divide H"
    nb = H // tile_h

    # ---- glue (plain JAX): layout, halo pad, BN folding, channel padding ----
    x_nhwc = jnp.transpose(x_nchw, (0, 2, 3, 1)).astype(compute_dtype)
    x_pad = jnp.pad(x_nhwc, ((0, 0), (1, 1), (1, 1), (0, 0)))   # (N, H+2, W+2, Cin)

    w_hwio = jnp.transpose(weight_oihw, (2, 3, 1, 0)).astype(compute_dtype)
    w_hwio = jnp.pad(w_hwio, ((0, 0), (0, 0), (0, 0), (0, Coutp - Cout)))

    scale = gamma / jnp.sqrt(running_var + eps)
    bias = beta - running_mean * scale
    scale = jnp.pad(scale, (0, Coutp - Cout)).reshape(1, Coutp).astype(jnp.float32)
    bias = jnp.pad(bias, (0, Coutp - Cout)).reshape(1, Coutp).astype(jnp.float32)

    # ---- BlockSpecs: row block + two single-row halo views of the same array ----
    in_specs = [
        pl.BlockSpec((1, tile_h, Wp, Cin), lambda n, i: (n, i, 0, 0)),
        pl.BlockSpec((1, 1, Wp, Cin), lambda n, i: (n, (i + 1) * tile_h, 0, 0)),
        pl.BlockSpec((1, 1, Wp, Cin), lambda n, i: (n, (i + 1) * tile_h + 1, 0, 0)),
        pl.BlockSpec((3, 3, Cin, Coutp), lambda n, i: (0, 0, 0, 0)),   # resident
        pl.BlockSpec((1, Coutp), lambda n, i: (0, 0)),                 # resident
        pl.BlockSpec((1, Coutp), lambda n, i: (0, 0)),                 # resident
    ]
    out_specs = pl.BlockSpec((1, tile_h, W, Coutp), lambda n, i: (n, i, 0, 0))

    # VMEM budget: double-buffered tiles + resident weights + accumulator, with
    # headroom, capped well below v7x's 64 MiB physical VMEM.
    in_bytes = (tile_h + 2) * Wp * Cin * in_itemsize
    out_bytes = tile_h * W * Coutp * 4
    w_bytes = 9 * Cin * Coutp * in_itemsize
    est = 2 * (in_bytes + out_bytes) + 2 * w_bytes + 2 * in_bytes + 3 * out_bytes + (2 << 20)
    vmem_limit = int(min(max(2 * est, 32 * 1024 * 1024), 48 * 1024 * 1024))

    y = pl.pallas_call(
        _duc_conv_kernel,
        out_shape=jax.ShapeDtypeStruct((N, H, W, Coutp), jnp.float32),
        grid_spec=pltpu.PrefetchScalarGridSpec(
            num_scalar_prefetch=0,
            grid=(N, nb),
            in_specs=in_specs,
            out_specs=out_specs),
        compiler_params=pltpu.CompilerParams(
            dimension_semantics=("parallel", "parallel"),
            vmem_limit_bytes=vmem_limit),
    )(x_pad, x_pad, x_pad, w_hwio, scale, bias)

    # ---- glue: drop channel padding, PixelShuffle(r), NHWC -> NCHW ----
    y = y[..., :Cout]
    c_ps = Cout // (r * r)
    y = y.reshape(N, H, W, c_ps, r, r)
    y = jnp.transpose(y, (0, 3, 1, 4, 2, 5)).reshape(N, c_ps, H * r, W * r)
    return y


def _reference(x_nchw, weight_oihw, gamma, beta, running_mean, running_var,
               eps=1e-5, r=2, compute_dtype=jnp.bfloat16):
    """Pure-JAX reference (lax conv). Inputs rounded to the kernel's MXU dtype."""
    x_nhwc = jnp.transpose(x_nchw, (0, 2, 3, 1)).astype(compute_dtype).astype(jnp.float32)
    w_hwio = jnp.transpose(weight_oihw, (2, 3, 1, 0)).astype(compute_dtype).astype(jnp.float32)
    y = jax.lax.conv_general_dilated(
        x_nhwc, w_hwio, window_strides=(1, 1), padding="SAME",
        dimension_numbers=("NHWC", "HWIO", "NHWC"),
        precision=jax.lax.Precision.HIGHEST)
    scale = gamma / jnp.sqrt(running_var + eps)
    bias = beta - running_mean * scale
    y = jnp.maximum(y * scale + bias, 0.0)
    N, H, W, Cout = y.shape
    c_ps = Cout // (r * r)
    y = y.reshape(N, H, W, c_ps, r, r)
    return jnp.transpose(y, (0, 3, 1, 4, 2, 5)).reshape(N, c_ps, H * r, W * r)


if __name__ == "__main__":
    key = jax.random.PRNGKey(0)
    k1, k2, k3, k4, k5, k6 = jax.random.split(key, 6)

    N, inplanes, planes, H, W = 2, 4, 8, 16, 16   # planes % 4 == 0 for PixelShuffle(2)

    x = jax.random.normal(k1, (N, inplanes, H, W), dtype=jnp.float32)
    weight = jax.random.normal(k2, (planes, inplanes, 3, 3), dtype=jnp.float32) * 0.1
    gamma = jax.random.normal(k3, (planes,), dtype=jnp.float32) * 0.1 + 1.0
    beta = jax.random.normal(k4, (planes,), dtype=jnp.float32) * 0.1
    running_mean = jax.random.normal(k5, (planes,), dtype=jnp.float32) * 0.1
    running_var = jnp.abs(jax.random.normal(k6, (planes,), dtype=jnp.float32)) * 0.5 + 0.5

    ref = _reference(x, weight, gamma, beta, running_mean, running_var)

    # Multi-row-block path (exercises the halo views across block boundaries).
    out = duc_forward(x, weight, gamma, beta, running_mean, running_var, tile_h=8)
    out = jax.block_until_ready(out)
    assert out.shape == (N, planes // 4, H * 2, W * 2)
    np.testing.assert_allclose(np.asarray(out), np.asarray(ref), rtol=2e-3, atol=2e-3)

    # Auto-chosen tile size (single row block at this small size).
    out2 = duc_forward(x, weight, gamma, beta, running_mean, running_var)
    out2 = jax.block_until_ready(out2)
    np.testing.assert_allclose(np.asarray(out2), np.asarray(ref), rtol=2e-3, atol=2e-3)

    print("KERNEL_OK")
</pallas_src>

<mosaic_0001>
module attributes {stable_mosaic.version = 11 : i64} {
  func.func @_duc_conv_kernel(%arg0: i32, %arg1: i32, %arg2: memref<1x8x18x4xbf16, #tpu.memory_space<vmem>>, %arg3: memref<1x1x18x4xbf16, #tpu.memory_space<vmem>>, %arg4: memref<1x1x18x4xbf16, #tpu.memory_space<vmem>>, %arg5: memref<3x3x4x128xbf16, #tpu.memory_space<vmem>>, %arg6: memref<1x128xf32, #tpu.memory_space<vmem>>, %arg7: memref<1x128xf32, #tpu.memory_space<vmem>>, %arg8: memref<1x8x16x128xf32, #tpu.memory_space<vmem>>) attributes {dimension_semantics = [#tpu.dimension_semantics<parallel>, #tpu.dimension_semantics<parallel>], iteration_bounds = array<i64: 2, 2>, scalar_prefetch = 0 : i64, scratch_operands = 0 : i64, tpu.core_type = #tpu.core_type<tc>, window_params = [{transform_indices = @transform_0, window_bounds = array<i64: 1, 8, 18, 4>}, {transform_indices = @transform_1, window_bounds = array<i64: 1, 1, 18, 4>}, {transform_indices = @transform_2, window_bounds = array<i64: 1, 1, 18, 4>}, {pipeline_mode = #tpu.pipeline_mode<synchronous>, transform_indices = @transform_3, window_bounds = array<i64: 3, 3, 4, 128>}, {pipeline_mode = #tpu.pipeline_mode<synchronous>, transform_indices = @transform_4, window_bounds = array<i64: 1, 128>}, {pipeline_mode = #tpu.pipeline_mode<synchronous>, transform_indices = @transform_5, window_bounds = array<i64: 1, 128>}, {transform_indices = @transform_6, window_bounds = array<i64: 1, 8, 16, 128>}]} {
    %c0 = arith.constant 0 : index
    %c0_0 = arith.constant 0 : index
    %c0_1 = arith.constant 0 : index
    %c0_2 = arith.constant 0 : index
    %0 = vector.load %arg2[%c0, %c0_0, %c0_1, %c0_2] : memref<1x8x18x4xbf16, #tpu.memory_space<vmem>>, vector<1x8x18x4xbf16>
    %1 = vector.shape_cast %0 : vector<1x8x18x4xbf16> to vector<8x18x4xbf16>
    %c0_3 = arith.constant 0 : index
    %c0_4 = arith.constant 0 : index
    %c0_5 = arith.constant 0 : index
    %c0_6 = arith.constant 0 : index
    %2 = vector.load %arg3[%c0_3, %c0_4, %c0_5, %c0_6] : memref<1x1x18x4xbf16, #tpu.memory_space<vmem>>, vector<1x1x18x4xbf16>
    %3 = vector.shape_cast %2 : vector<1x1x18x4xbf16> to vector<1x18x4xbf16>
    %c0_7 = arith.constant 0 : index
    %c0_8 = arith.constant 0 : index
    %c0_9 = arith.constant 0 : index
    %c0_10 = arith.constant 0 : index
    %4 = vector.load %arg4[%c0_7, %c0_8, %c0_9, %c0_10] : memref<1x1x18x4xbf16, #tpu.memory_space<vmem>>, vector<1x1x18x4xbf16>
    %5 = vector.shape_cast %4 : vector<1x1x18x4xbf16> to vector<1x18x4xbf16>
    %6 = tpu.concatenate %1, %3, %5 in 0 : vector<8x18x4xbf16>, vector<1x18x4xbf16>, vector<1x18x4xbf16> -> vector<10x18x4xbf16>
    %c0_11 = arith.constant 0 : index
    %c0_12 = arith.constant 0 : index
    %c0_13 = arith.constant 0 : index
    %c0_14 = arith.constant 0 : index
    %7 = vector.load %arg5[%c0_11, %c0_12, %c0_13, %c0_14] : memref<3x3x4x128xbf16, #tpu.memory_space<vmem>>, vector<3x3x4x128xbf16>
    %cst = arith.constant 0.000000e+00 : f32
    %8 = vector.broadcast %cst : f32 to vector<128x128xf32>
    %9 = vector.extract_strided_slice %6 {offsets = [0, 0, 0], sizes = [8, 16, 4], strides = [1, 1, 1]} : vector<10x18x4xbf16> to vector<8x16x4xbf16>
    %10 = vector.shape_cast %9 : vector<8x16x4xbf16> to vector<128x4xbf16>
    %11 = vector.extract_strided_slice %7 {offsets = [0, 0, 0, 0], sizes = [1, 1, 4, 128], strides = [1, 1, 1, 1]} : vector<3x3x4x128xbf16> to vector<1x1x4x128xbf16>
    %12 = vector.shape_cast %11 : vector<1x1x4x128xbf16> to vector<4x128xbf16>
    %cst_15 = arith.constant dense<0.000000e+00> : vector<128x128xf32>
    %13 = tpu.matmul %10, %12, %cst_15 {dimension_numbers = #tpu.dot_dimension_numbers<[1], [0], [0], [1], [0, 0, 1, 1], [], []>} : vector<128x4xbf16>, vector<4x128xbf16>, vector<128x128xf32> -> vector<128x128xf32>
    %14 = arith.addf %8, %13 : vector<128x128xf32>
    %15 = vector.extract_strided_slice %6 {offsets = [0, 1, 0], sizes = [8, 16, 4], strides = [1, 1, 1]} : vector<10x18x4xbf16> to vector<8x16x4xbf16>
    %16 = vector.shape_cast %15 : vector<8x16x4xbf16> to vector<128x4xbf16>
    %17 = vector.extract_strided_slice %7 {offsets = [0, 1, 0, 0], sizes = [1, 1, 4, 128], strides = [1, 1, 1, 1]} : vector<3x3x4x128xbf16> to vector<1x1x4x128xbf16>
    %18 = vector.shape_cast %17 : vector<1x1x4x128xbf16> to vector<4x128xbf16>
    %cst_16 = arith.constant dense<0.000000e+00> : vector<128x128xf32>
    %19 = tpu.matmul %16, %18, %cst_16 {dimension_numbers = #tpu.dot_dimension_numbers<[1], [0], [0], [1], [0, 0, 1, 1], [], []>} : vector<128x4xbf16>, vector<4x128xbf16>, vector<128x128xf32> -> vector<128x128xf32>
    %20 = arith.addf %14, %19 : vector<128x128xf32>
    %21 = vector.extract_strided_slice %6 {offsets = [0, 2, 0], sizes = [8, 16, 4], strides = [1, 1, 1]} : vector<10x18x4xbf16> to vector<8x16x4xbf16>
    %22 = vector.shape_cast %21 : vector<8x16x4xbf16> to vector<128x4xbf16>
    %23 = vector.extract_strided_slice %7 {offsets = [0, 2, 0, 0], sizes = [1, 1, 4, 128], strides = [1, 1, 1, 1]} : vector<3x3x4x128xbf16> to vector<1x1x4x128xbf16>
    %24 = vector.shape_cast %23 : vector<1x1x4x128xbf16> to vector<4x128xbf16>
    %cst_17 = arith.constant dense<0.000000e+00> : vector<128x128xf32>
    %25 = tpu.matmul %22, %24, %cst_17 {dimension_numbers = #tpu.dot_dimension_numbers<[1], [0], [0], [1], [0, 0, 1, 1], [], []>} : vector<128x4xbf16>, vector<4x128xbf16>, vector<128x128xf32> -> vector<128x128xf32>
    %26 = arith.addf %20, %25 : vector<128x128xf32>
    %27 = vector.extract_strided_slice %6 {offsets = [1, 0, 0], sizes = [8, 16, 4], strides = [1, 1, 1]} : vector<10x18x4xbf16> to vector<8x16x4xbf16>
    %28 = vector.shape_cast %27 : vector<8x16x4xbf16> to vector<128x4xbf16>
    %29 = vector.extract_strided_slice %7 {offsets = [1, 0, 0, 0], sizes = [1, 1, 4, 128], strides = [1, 1, 1, 1]} : vector<3x3x4x128xbf16> to vector<1x1x4x128xbf16>
    %30 = vector.shape_cast %29 : vector<1x1x4x128xbf16> to vector<4x128xbf16>
    %cst_18 = arith.constant dense<0.000000e+00> : vector<128x128xf32>
    %31 = tpu.matmul %28, %30, %cst_18 {dimension_numbers = #tpu.dot_dimension_numbers<[1], [0], [0], [1], [0, 0, 1, 1], [], []>} : vector<128x4xbf16>, vector<4x128xbf16>, vector<128x128xf32> -> vector<128x128xf32>
    %32 = arith.addf %26, %31 : vector<128x128xf32>
    %33 = vector.extract_strided_slice %6 {offsets = [1, 1, 0], sizes = [8, 16, 4], strides = [1, 1, 1]} : vector<10x18x4xbf16> to vector<8x16x4xbf16>
    %34 = vector.shape_cast %33 : vector<8x16x4xbf16> to vector<128x4xbf16>
    %35 = vector.extract_strided_slice %7 {offsets = [1, 1, 0, 0], sizes = [1, 1, 4, 128], strides = [1, 1, 1, 1]} : vector<3x3x4x128xbf16> to vector<1x1x4x128xbf16>
    %36 = vector.shape_cast %35 : vector<1x1x4x128xbf16> to vector<4x128xbf16>
    %cst_19 = arith.constant dense<0.000000e+00> : vector<128x128xf32>
    %37 = tpu.matmul %34, %36, %cst_19 {dimension_numbers = #tpu.dot_dimension_numbers<[1], [0], [0], [1], [0, 0, 1, 1], [], []>} : vector<128x4xbf16>, vector<4x128xbf16>, vector<128x128xf32> -> vector<128x128xf32>
    %38 = arith.addf %32, %37 : vector<128x128xf32>
    %39 = vector.extract_strided_slice %6 {offsets = [1, 2, 0], sizes = [8, 16, 4], strides = [1, 1, 1]} : vector<10x18x4xbf16> to vector<8x16x4xbf16>
    %40 = vector.shape_cast %39 : vector<8x16x4xbf16> to vector<128x4xbf16>
    %41 = vector.extract_strided_slice %7 {offsets = [1, 2, 0, 0], sizes = [1, 1, 4, 128], strides = [1, 1, 1, 1]} : vector<3x3x4x128xbf16> to vector<1x1x4x128xbf16>
    %42 = vector.shape_cast %41 : vector<1x1x4x128xbf16> to vector<4x128xbf16>
    %cst_20 = arith.constant dense<0.000000e+00> : vector<128x128xf32>
    %43 = tpu.matmul %40, %42, %cst_20 {dimension_numbers = #tpu.dot_dimension_numbers<[1], [0], [0], [1], [0, 0, 1, 1], [], []>} : vector<128x4xbf16>, vector<4x128xbf16>, vector<128x128xf32> -> vector<128x128xf32>
    %44 = arith.addf %38, %43 : vector<128x128xf32>
    %45 = vector.extract_strided_slice %6 {offsets = [2, 0, 0], sizes = [8, 16, 4], strides = [1, 1, 1]} : vector<10x18x4xbf16> to vector<8x16x4xbf16>
    %46 = vector.shape_cast %45 : vector<8x16x4xbf16> to vector<128x4xbf16>
    %47 = vector.extract_strided_slice %7 {offsets = [2, 0, 0, 0], sizes = [1, 1, 4, 128], strides = [1, 1, 1, 1]} : vector<3x3x4x128xbf16> to vector<1x1x4x128xbf16>
    %48 = vector.shape_cast %47 : vector<1x1x4x128xbf16> to vector<4x128xbf16>
    %cst_21 = arith.constant dense<0.000000e+00> : vector<128x128xf32>
    %49 = tpu.matmul %46, %48, %cst_21 {dimension_numbers = #tpu.dot_dimension_numbers<[1], [0], [0], [1], [0, 0, 1, 1], [], []>} : vector<128x4xbf16>, vector<4x128xbf16>, vector<128x128xf32> -> vector<128x128xf32>
    %50 = arith.addf %44, %49 : vector<128x128xf32>
    %51 = vector.extract_strided_slice %6 {offsets = [2, 1, 0], sizes = [8, 16, 4], strides = [1, 1, 1]} : vector<10x18x4xbf16> to vector<8x16x4xbf16>
    %52 = vector.shape_cast %51 : vector<8x16x4xbf16> to vector<128x4xbf16>
    %53 = vector.extract_strided_slice %7 {offsets = [2, 1, 0, 0], sizes = [1, 1, 4, 128], strides = [1, 1, 1, 1]} : vector<3x3x4x128xbf16> to vector<1x1x4x128xbf16>
    %54 = vector.shape_cast %53 : vector<1x1x4x128xbf16> to vector<4x128xbf16>
    %cst_22 = arith.constant dense<0.000000e+00> : vector<128x128xf32>
    %55 = tpu.matmul %52, %54, %cst_22 {dimension_numbers = #tpu.dot_dimension_numbers<[1], [0], [0], [1], [0, 0, 1, 1], [], []>} : vector<128x4xbf16>, vector<4x128xbf16>, vector<128x128xf32> -> vector<128x128xf32>
    %56 = arith.addf %50, %55 : vector<128x128xf32>
    %57 = vector.extract_strided_slice %6 {offsets = [2, 2, 0], sizes = [8, 16, 4], strides = [1, 1, 1]} : vector<10x18x4xbf16> to vector<8x16x4xbf16>
    %58 = vector.shape_cast %57 : vector<8x16x4xbf16> to vector<128x4xbf16>
    %59 = vector.extract_strided_slice %7 {offsets = [2, 2, 0, 0], sizes = [1, 1, 4, 128], strides = [1, 1, 1, 1]} : vector<3x3x4x128xbf16> to vector<1x1x4x128xbf16>
    %60 = vector.shape_cast %59 : vector<1x1x4x128xbf16> to vector<4x128xbf16>
    %cst_23 = arith.constant dense<0.000000e+00> : vector<128x128xf32>
    %61 = tpu.matmul %58, %60, %cst_23 {dimension_numbers = #tpu.dot_dimension_numbers<[1], [0], [0], [1], [0, 0, 1, 1], [], []>} : vector<128x4xbf16>, vector<4x128xbf16>, vector<128x128xf32> -> vector<128x128xf32>
    %62 = arith.addf %56, %61 : vector<128x128xf32>
    %c0_24 = arith.constant 0 : index
    %c0_25 = arith.constant 0 : index
    %63 = vector.load %arg6[%c0_24, %c0_25] : memref<1x128xf32, #tpu.memory_space<vmem>>, vector<1x128xf32>
    %64 = vector.broadcast %63 : vector<1x128xf32> to vector<128x128xf32>
    %65 = arith.mulf %62, %64 : vector<128x128xf32>
    %c0_26 = arith.constant 0 : index
    %c0_27 = arith.constant 0 : index
    %66 = vector.load %arg7[%c0_26, %c0_27] : memref<1x128xf32, #tpu.memory_space<vmem>>, vector<1x128xf32>
    %67 = vector.broadcast %66 : vector<1x128xf32> to vector<128x128xf32>
    %68 = arith.addf %65, %67 : vector<128x128xf32>
    %cst_28 = arith.constant 0.000000e+00 : f32
    %69 = vector.broadcast %cst_28 : f32 to vector<128x128xf32>
    %70 = arith.maximumf %68, %69 : vector<128x128xf32>
    %71 = vector.shape_cast %70 : vector<128x128xf32> to vector<1x8x16x128xf32>
    %c0_29 = arith.constant 0 : index
    %c0_30 = arith.constant 0 : index
    %c0_31 = arith.constant 0 : index
    %c0_32 = arith.constant 0 : index
    %72 = vector.load %arg8[%c0_29, %c0_30, %c0_31, %c0_32] : memref<1x8x16x128xf32, #tpu.memory_space<vmem>>, vector<1x8x16x128xf32>
    tpu.vector_store %arg8[%c0_29, %c0_30, %c0_31, %c0_32], %71 {strides = array<i32>} : memref<1x8x16x128xf32, #tpu.memory_space<vmem>>, vector<1x8x16x128xf32>,
    return
  }
  func.func @transform_0(%arg0: i32, %arg1: i32) -> (i32, i32, i32, i32) {
    %c0_i32 = arith.constant 0 : i32
    %c0_i32_0 = arith.constant 0 : i32
    %c0_i32_1 = arith.constant 0 : i32
    return %arg0, %arg1, %c0_i32, %c0_i32_0 : i32, i32, i32, i32
  }
  func.func @transform_1(%arg0: i32, %arg1: i32) -> (i32, i32, i32, i32) {
    %c1_i32 = arith.constant 1 : i32
    %0 = arith.addi %arg1, %c1_i32 : i32
    %c8_i32 = arith.constant 8 : i32
    %1 = arith.muli %0, %c8_i32 : i32
    %c0_i32 = arith.constant 0 : i32
    %c0_i32_0 = arith.constant 0 : i32
    %c0_i32_1 = arith.constant 0 : i32
    return %arg0, %1, %c0_i32, %c0_i32_0 : i32, i32, i32, i32
  }
  func.func @transform_2(%arg0: i32, %arg1: i32) -> (i32, i32, i32, i32) {
    %c1_i32 = arith.constant 1 : i32
    %0 = arith.addi %arg1, %c1_i32 : i32
    %c8_i32 = arith.constant 8 : i32
    %1 = arith.muli %0, %c8_i32 : i32
    %c1_i32_0 = arith.constant 1 : i32
    %2 = arith.addi %1, %c1_i32_0 : i32
    %c0_i32 = arith.constant 0 : i32
    %c0_i32_1 = arith.constant 0 : i32
    %c0_i32_2 = arith.constant 0 : i32
    return %arg0, %2, %c0_i32, %c0_i32_1 : i32, i32, i32, i32
  }
  func.func @transform_3(%arg0: i32, %arg1: i32) -> (i32, i32, i32, i32) {
    %c0_i32 = arith.constant 0 : i32
    %c0_i32_0 = arith.constant 0 : i32
    %c0_i32_1 = arith.constant 0 : i32
    %c0_i32_2 = arith.constant 0 : i32
    %c0_i32_3 = arith.constant 0 : i32
    return %c0_i32, %c0_i32_0, %c0_i32_1, %c0_i32_2 : i32, i32, i32, i32
  }
  func.func @transform_4(%arg0: i32, %arg1: i32) -> (i32, i32) {
    %c0_i32 = arith.constant 0 : i32
    %c0_i32_0 = arith.constant 0 : i32
    %c0_i32_1 = arith.constant 0 : i32
    return %c0_i32, %c0_i32_0 : i32, i32
  }
  func.func @transform_5(%arg0: i32, %arg1: i32) -> (i32, i32) {
    %c0_i32 = arith.constant 0 : i32
    %c0_i32_0 = arith.constant 0 : i32
    %c0_i32_1 = arith.constant 0 : i32
    return %c0_i32, %c0_i32_0 : i32, i32
  }
  func.func @transform_6(%arg0: i32, %arg1: i32) -> (i32, i32, i32, i32) {
    %c0_i32 = arith.constant 0 : i32
    %c0_i32_0 = arith.constant 0 : i32
    %c0_i32_1 = arith.constant 0 : i32
    return %arg0, %arg1, %c0_i32, %c0_i32_0 : i32, i32, i32, i32
  }
}

</mosaic_0001>

<bundles_post_ra>
// kernel: duc_forward.1
= control target key start
LH: loop header
LB: loop body
LE: loop exit
PB: predicated region body
PF: predicated region fallthrough
CT: control target
= control target key end

     0   :  { %s2882_s21 = smov 0   ;;  %s2884_s22 = smov 0   ;;  %s3580_s0 = inlined_call_operand.vmem [shape: bf16[2,18,18,4], index: 0, kind: input, shape index: {}, may-alias: {0,1,2}]   ;;  %s3581_s1 = inlined_call_operand.vmem [shape: bf16[2,18,18,4], index: 1, kind: input, shape index: {}, may-alias: {0,1,2}]   ;;  %s3582_s2 = inlined_call_operand.vmem [shape: bf16[2,18,18,4], index: 2, kind: input, shape index: {}, may-alias: {0,1,2}]   ;;  %s3583_s3 = inlined_call_operand.vmem [shape: bf16[3,3,4,128], index: 3, kind: input, shape index: {}]   ;;  %s3584_s4 = inlined_call_operand.vmem [shape: f32[1,128], index: 4, kind: input, shape index: {}]   ;;  %s3585_s5 = inlined_call_operand.vmem [shape: f32[1,128], index: 5, kind: input, shape index: {}]   ;;  %s3586_s6 = inlined_call_operand.vmem [shape: f32[2,16,16,128], index: 6, kind: output, shape index: {}]  }
   0x1   :  { %s2886_s23 = smov 0   ;;  %s2888_s24 = smov 0  }
   0x2   :  { %s2890_s25 = smov 0  }
   0x3 LB: > { %s25_s26 = sadd.s32 1, %s2837_s23  ;;  %s28_s27 = sadd.s32 1, %s2841_s24  ;;  %s2845_s25 = sphi %s2890_s25, %s16_s25   ;;  %s2841_s24 = sphi %s2888_s24, %s3595_s24   ;;  %s2837_s23 = sphi %s2886_s23, %s3594_s23   ;;  %s2833_s22 = sphi %s2884_s22, %s3593_s22   ;;  %s2829_s21 = sphi %s2882_s21, %s3592_s21  }
   0x4   : > { %p26_p0 = scmp.ge.s32.totalorder %s25_s26, 2  ;;  %p2231_p1 = scmp.ge.s32.totalorder %s2845_s25, 1 }
   0x5   : > { %p296_p2 = scmp.lt.s32.totalorder %s2845_s25, 5 }
   0x6   : > { %s3597_s26 = smov (%p26_p0, %s25_s26), 0  ;;  %s3599_s27 = smov (!%p26_p0, %s28_s27), %s2841_s24 }
   0x7   : > { %p297_p3 = pnand %p2231_p1, %p296_p2  ;;  %p30_p4 = scmp.ge.s32.totalorder %s3599_s27, 2 }
   0x8   : > { %v456_v0 = vld [vmem:[%s3583_s3 + $0x2] sm:$0x3] (!%p297_p3)  ;;  %vm708_vm0 = vcmask (!%p297_p3), 1041408   ;;  %v2918_v1 = vld [vmem:[%s3583_s3 + $0x8] sm:$0x3] (!%p297_p3)  ;;  %s2920_s8 = sshll.u32 (!%p297_p3), %s2829_s21, 3 }
   0x9   : > { %s3601_s27 = smov (%p30_p4, %s3599_s27), 0  ;;  %300 = sbr.rel (%p297_p3) target bundleno = 407 (0x197), region = 44 }
   0xa   : > { %2743 = vmatprep.subr.msk.bf16.mxu1 (!%p297_p3), %vm708_vm0, %v456_v0  ;;  %2747 = vmatprep.subr.msk.bf16.mxu0 (!%p297_p3), %vm708_vm0, %v2918_v1  ;;  %v710_v2 = vsel (!%p297_p3), %vm708_vm0, %v456_v0, 0  ;;  %v2928_v3 = vsel (!%p297_p3), %vm708_vm0, %v2918_v1, 0  ;;  %p370_p5 = scmp.lt.s32.totalorder (!%p297_p3), %s2833_s22, 1  ;;  %p372_p6 = scmp.lt.s32.totalorder (!%p297_p3), %s2920_s8, 17  ;;  %v455_v4 = vld [vmem:[%s3583_s3] sm:$0x3] (!%p297_p3) }
   0xb   : > { %2452 = vmatpush3.bf16.msra.mxu1 (!%p297_p3), %v710_v2  ;;  %2524 = vmatpush3.bf16.msra.mxu0 (!%p297_p3), %v2928_v3  ;;  %v460_v5 = vld [vmem:[%s3583_s3 + $0xa] sm:$0x3] (!%p297_p3)  ;;  %vm464_vm1 = vsmask.f32 (!%p297_p3), 3328  ;;  %vm465_vm2 = vsmask.f32 (!%p297_p3), 7440 }
   0xc   : > { %2744 = vmatprep.subr.msk.bf16.mxu1 (!%p297_p3), %vm708_vm0, %v455_v4  ;;  %2749 = vmatprep.subr.msk.bf16.mxu0 (!%p297_p3), %vm708_vm0, %v460_v5  ;;  %v2953_v6 = vsel (!%p297_p3), %vm708_vm0, %v455_v4, 0  ;;  %vm683_vm3 = vcmask (!%p297_p3), 31744   ;;  %v2979_v18 = vsel (!%p297_p3), %vm708_vm0, %v460_v5, 0  ;;  %v2984_v23 = vld [vmem:[%s3583_s3 + $0xc] sm:$0x3] (!%p297_p3)  ;;  %vm2996_vm4 = vmor (!%p297_p3), %vm464_vm1, %vm465_vm2  ;;  %vm981_vm5 = vcmask (!%p297_p3), 1042432  }
   0xd   : > { %v3005_v38 = vsel (!%p297_p3), %vm708_vm0, %v2984_v23, 0  ;;  %vm982_vm6 = vcmask (!%p297_p3), 1046532   ;;  %s3085_s7 = sadd.s32 (!%p297_p3), 8, %s2920_s8  ;;  %p416_p9 = scmp.lt.s32.totalorder (!%p297_p3), %s2920_s8, 15 }
   0xe   : > { %vm3079_vm7 = vmor (!%p297_p3), %vm981_vm5, %vm982_vm6  ;;  %p389_p7 = scmp.lt.s32.totalorder (!%p297_p3), %s3085_s7, 17  ;;  %s400_s9 = sadd.s32 (!%p297_p3), 1, %s3085_s7 }
   0xf   : > { %p3167_p8 = scmp.lt.s32.totalorder (!%p297_p3), %s400_s9, 17 }
  0x10   : > { %s3603_s22 = smov (!%p370_p5, %s2833_s22), 1 }
  0x11   : > { %s373_s13 = scalar_select %p372_p6, %s2920_s8, 17 }
  0x12   : > { %s2944_s14 = smul.u32 54, %s3603_s22  ;;  %s3605_s9 = smov (!%p3167_p8, %s400_s9), 17 }
  0x13   : > { %s2753_s15 = smul.u32 3, %s373_s13  ;;  %s3607_s8 = smov (!%p416_p9, %s2920_s8), 15 }
  0x14   : > { %s3142_s10 = scalar_select %p389_p7, %s3085_s7, 17 }
  0x15   : > { %s376_s16 = sadd.s32 %s2944_s14, %s2753_s15  ;;  %s2240_s15 = sshll.u32 %s3603_s22, 5 }
  0x16   : > { %s2233_s17 = sshll.u32 %s376_s16, 2  ;;  %s2755_s12 = smul.u32 3, %s3142_s10 }
  0x17   : > { %s2950_s20 = scalar_lea.vmem %s3580_s0, %s2233_s17  ;;  %s2756_s17 = smul.u32 3, %s3605_s9 }
  0x18   : > { %v2956_v7 = vld [vmem:[%s2950_s20] sm:$0xf]  ;;  %v2959_v8 = vld [vmem:[%s2950_s20 + $0x4] sm:$0xf]  ;;  %v2962_v9 = vld [vmem:[%s2950_s20 + $0x8] sm:$0x1]  ;;  %s3204_s13 = sadd.s32 %s2755_s12, %s2944_s14 }
  0x19   : > { %v468_v10 = vshrl.u32 %v2956_v7, 16  ;;  %v471_v11 = vshll.u32 %v2956_v7, 16  ;;  %v477_v12 = vshll.u32 %v2959_v8, 16  ;;  %v481_v13 = vshrl.u32 %v2959_v8, 16  ;;  %v2969_v14 = vld [vmem:[%s2950_s20 + $0xc] sm:$0xf]  ;;  %s3251_s28 = sadd.s32 %s2756_s17, %s2944_s14 }
  0x1a   : > { %v487_v15 = vshll.u32 %v2962_v9, 16  ;;  %v2973_v16 = vld [vmem:[%s2950_s20 + $0x10] sm:$0xf]  ;;  %v2976_v17 = vld [vmem:[%s2950_s20 + $0x14] sm:$0x1]  ;;  %v492_v25 = vshrl.u32 %v2969_v14, 16 }
  0x1b   : > { %v470_v19 = vrot.slane %v468_v10, 4  ;;  %v473_v20 = vrot.slane %v471_v11, 5  ;;  %v479_v21 = vrot.slane %v477_v12, 5  ;;  %v483_v22 = vrot.slane %v481_v13, 4  ;;  %v2992_v32 = vld [vmem:[%s2950_s20 + $0x18] sm:$0xf] }
  0x1c   : > { %v489_v24 = vrot.slane %v487_v15, 5  ;;  %v495_v26 = vshll.u32 %v2969_v14, 16  ;;  %v501_v27 = vshll.u32 %v2973_v16, 16  ;;  %v505_v30 = vshrl.u32 %v2973_v16, 16  ;;  %v3001_v37 = vld [vmem:[%s2950_s20 + $0x1c] sm:$0xf] }
  0x1d   : > { %v474_v28 = vor.u32 %v473_v20, %v470_v19  ;;  %v484_v29 = vor.u32 %v483_v22, %v479_v21  ;;  %v511_v31 = vshll.u32 %v2976_v17, 16  ;;  %v494_v34 = vrot.slane %v492_v25, 4  ;;  %v3009_v45 = vld [vmem:[%s2950_s20 + $0x20] sm:$0x1]  ;;  %v3019_v56 = vld [vmem:[%s2950_s20 + $0x24] sm:$0xf] }
  0x1e   : > { %v497_v35 = vrot.slane %v495_v26, 5  ;;  %v503_v36 = vrot.slane %v501_v27, 5  ;;  %v507_v41 = vrot.slane %v505_v30, 4  ;;  %v996_v44 = vrot.slane %v2976_v17, 5  ;;  %v3024_v61 = vld [vmem:[%s2950_s20 + $0x28] sm:$0xf] }
  0x1f   : > { %v475_v39 = vrot.slane %v474_v28, 4  ;;  %v485_v40 = vrot.slane %v484_v29, 4  ;;  %v513_v42 = vrot.slane %v511_v31, 5  ;;  %v516_v46 = vshrl.u32 %v2992_v32, 16  ;;  %v3032_v4 = vld [vmem:[%s2950_s20 + $0x2c] sm:$0x1] }
  0x20   : > { %v498_v43 = vor.u32 %v497_v35, %v494_v34  ;;  %v519_v47 = vshll.u32 %v2992_v32, 16  ;;  %v508_v50 = vor.u32 %v507_v41, %v503_v36  ;;  %v525_v51 = vshll.u32 %v3001_v37, 16  ;;  %v3038_v13 = vld [vmem:[%s2950_s20 + $0x30] sm:$0xf]  ;;  %v3045_v22 = vld [vmem:[%s3583_s3 + $0x4] sm:$0x3] }
  0x21   : > { %v480_v48 = vsel %vm2996_vm4, %v475_v39, %v479_v21  ;;  %v490_v49 = vsel %vm2996_vm4, %v485_v40, %v489_v24  ;;  %v518_v54 = vrot.slane %v516_v46, 4  ;;  %v529_v59 = vshrl.u32 %v3001_v37, 16  ;;  %v3050_v28 = vld [vmem:[%s2950_s20 + $0x34] sm:$0xf]  ;;  %v3057_v34 = vld [vmem:[%s2950_s20 + $0x38] sm:$0x1] }
  0x22   : > { %v2242_v52 = vcombine.low %v480_v48, %v490_v49  ;;  %v499_v53 = vrot.slane %v498_v43, 4  ;;  %v521_v55 = vrot.slane %v519_v47, 5  ;;  %v509_v57 = vrot.slane %v508_v50, 4  ;;  %s2235_s18 = sshll.u32 %s3204_s13, 2  ;;  %s2237_s14 = sshll.u32 %s3251_s28, 2 }
  0x23   : > { %v527_v58 = vrot.slane %v525_v51, 5  ;;  %v535_v60 = vshll.u32 %v3009_v45, 16  ;;  %v1000_v0 = vrot.slane %v3001_v37, 5  ;;  %v1003_v2 = vrot.slane %v3009_v45, 5  ;;  %v3070_v51 = vld [vmem:[%s2950_s20 + $0x3c] sm:$0xf]  ;;  %s395_s21 = scalar_lea.vmem %s3581_s1, %s2235_s18  ;;  %s409_s7 = scalar_lea.vmem %s3582_s2, %s2237_s14 }
  0x24   : > { %2453 = vmatprep.mubr.msk.bf16.mxu1 %vm683_vm3, %v2242_v52  ;;  %v504_v62 = vsel %vm2996_vm4, %v499_v53, %v503_v36  ;;  %v522_v63 = vor.u32 %v521_v55, %v518_v54  ;;  %v514_v5 = vsel %vm2996_vm4, %v509_v57, %v513_v42  ;;  %v531_v10 = vrot.slane %v529_v59, 4  ;;  %v3075_v57 = vld [vmem:[%s2950_s20 + $0x40] sm:$0xf]  ;;  %s2239_s13 = sshll.u32 %s3607_s8, 1 }
  0x25   : > { %v537_v11 = vrot.slane %v535_v60, 5  ;;  %v540_v12 = vshrl.u32 %v3019_v56, 16  ;;  %v2243_v15 = vcombine.low %v504_v62, %v514_v5  ;;  %v543_v20 = vshll.u32 %v3019_v56, 16  ;;  %s420_s16 = sadd.s32 %s2240_s15, %s2239_s13 }
  0x26   : > { %v523_v19 = vrot.slane %v522_v63, 4  ;;  %v549_v21 = vshll.u32 %v3024_v61, 16  ;;  %v532_v24 = vor.u32 %v531_v10, %v527_v58  ;;  %v553_v26 = vshrl.u32 %v3024_v61, 16 }
  0x27   : > { %v542_v25 = vrot.slane %v540_v12, 4  ;;  %v559_v27 = vshll.u32 %v3032_v4, 16  ;;  %2525 = vmatprep.mubr.msk.bf16.mxu0 %vm683_vm3, %v2243_v15  ;;  %2454 = vmatmul.mubr.msk.bf16.vlgmr.msra.gmra.mrb[0].mxu1 %vm683_vm3, %v2243_v15  ;;  %v545_v30 = vrot.slane %v543_v20, 5  ;;  %v564_v35 = vshrl.u32 %v3038_v13, 16  ;;  %v3099_v20 = vld [vmem:[%s2950_s20 + $0x44] sm:$0x1] }
  0x28   : > { %v528_v29 = vsel %vm2996_vm4, %v523_v19, %v527_v58  ;;  %v551_v31 = vrot.slane %v549_v21, 5  ;;  %2470 = vmatpush3.bf16.msra.mxu1 %v2953_v6  ;;  %v533_v36 = vrot.slane %v532_v24, 4  ;;  %v555_v39 = vrot.slane %v553_v26, 4 }
  0x29   : > { %v561_v40 = vrot.slane %v559_v27, 5  ;;  %v567_v41 = vshll.u32 %v3038_v13, 16  ;;  %v546_v42 = vor.u32 %v545_v30, %v542_v25  ;;  %v566_v43 = vrot.slane %v564_v35, 4  ;;  %2745 = vmatprep.subr.msk.bf16.mxu1 %vm708_vm0, %v3045_v22 }
  0x2a   : > { %v573_v46 = vshll.u32 %v3050_v28, 16  ;;  %v577_v47 = vshrl.u32 %v3050_v28, 16  ;;  %v538_v48 = vsel %vm2996_vm4, %v533_v36, %v537_v11  ;;  %v556_v6 = vor.u32 %v555_v39, %v551_v31  ;;  %v3113_v36 = vld [vmem:[%s2950_s20 + $0x48] sm:$0xf] }
  0x2b   : > { %v569_v49 = vrot.slane %v567_v41, 5  ;;  %v583_v50 = vshll.u32 %v3057_v34, 16  ;;  %v3072_v52 = vcombine.low %v528_v29, %v538_v48  ;;  %v547_v53 = vrot.slane %v546_v42, 4  ;;  %v3128_v42 = vld [vmem:[%s2950_s20 + $0x4c] sm:$0xf] }
  0x2c   : > { %v575_v54 = vrot.slane %v573_v46, 5  ;;  %v579_v55 = vrot.slane %v577_v47, 4  ;;  %v557_v58 = vrot.slane %v556_v6, 4  ;;  %v2275_v63 = vrot.slane %v2969_v14, 9 }
  0x2d   : > { %v570_v59 = vor.u32 %v569_v49, %v566_v43  ;;  %v585_v60 = vrot.slane %v583_v50, 5  ;;  %2526 = vmatmul.mubr.msk.bf16.vlgmr.msra.gmra.mrb[0].mxu0 %vm683_vm3, %v3072_v52  ;;  %2457 = vmatprep.mubr.msk.bf16.mxu1 %vm683_vm3, %v3072_v52  ;;  %v552_v5 = vsel %vm2996_vm4, %v547_v53, %v551_v31  ;;  %v993_v11 = vrot.slane %v2973_v16, 5 }
  0x2e   : > { %v580_v10 = vor.u32 %v579_v55, %v575_v54  ;;  %v588_v12 = vshrl.u32 %v3070_v51, 16  ;;  %2542 = vmatpush3.bf16.msra.mxu0 %v2979_v18  ;;  %v562_v15 = vsel %vm2996_vm4, %v557_v58, %v561_v40  ;;  %v591_v21 = vshll.u32 %v3070_v51, 16 }
  0x2f   : > { %v571_v19 = vrot.slane %v570_v59, 4  ;;  %v597_v24 = vshll.u32 %v3075_v57, 16  ;;  %v3103_v25 = vcombine.low %v552_v5, %v562_v15  ;;  %v994_v27 = vsel %vm3079_vm7, %v2275_v63, %v993_v11  ;;  %2750 = vmatprep.subr.msk.bf16.mxu0 %vm708_vm0, %v2984_v23 }
  0x30   : > { %v581_v26 = vrot.slane %v580_v10, 4  ;;  %v995_v29 = vrot.slane %v993_v11, 4  ;;  %v590_v30 = vrot.slane %v588_v12, 4  ;;  %v593_v31 = vrot.slane %v591_v21, 5 }
  0x31   : > { %v576_v18 = vsel %vm2996_vm4, %v571_v19, %v575_v54  ;;  %v599_v35 = vrot.slane %v597_v24, 5  ;;  %2529 = vmatprep.mubr.msk.bf16.mxu0 %vm683_vm3, %v3103_v25  ;;  %2458 = vmatmul.mubr.msk.bf16.gmra.mrb[4].mxu1 %vm683_vm3, %v3103_v25  ;;  %v601_v40 = vshrl.u32 %v3075_v57, 16  ;;  %v607_v41 = vshll.u32 %v3099_v20, 16  ;;  %v3151_v54 = vld [vmem:[%s2950_s20 + $0x50] sm:$0x1] }
  0x32   : > { %v586_v23 = vsel %vm2996_vm4, %v581_v26, %v585_v60  ;;  %v997_v39 = vsel %vm3079_vm7, %v995_v29, %v996_v44  ;;  %v594_v47 = vor.u32 %v593_v31, %v590_v30  ;;  %v2276_v48 = vrot.slane %v2992_v32, 9  ;;  %v3183_v29 = vld [vmem:[%s2950_s20 + $0x58] sm:$0xf] }
  0x33   : > { %v3130_v43 = vcombine.low %v576_v18, %v586_v23  ;;  %v3132_v46 = vcombine.low %v994_v27, %v997_v39  ;;  %v603_v6 = vrot.slane %v601_v40, 4  ;;  %v609_v17 = vrot.slane %v607_v41, 5  ;;  %v3189_v23 = vld [vmem:[%s2950_s20 + $0x5c] sm:$0x1] }
  0x34   : > { %v1002_v44 = vrot.slane %v1000_v0, 4  ;;  %v612_v49 = vshrl.u32 %v3113_v36, 16  ;;  %v595_v50 = vrot.slane %v594_v47, 4  ;;  %v1001_v53 = vsel %vm3079_vm7, %v2276_v48, %v1000_v0  ;;  %v3163_v0 = vld [vmem:[%s2950_s20 + $0x54] sm:$0xf] }
  0x35   : > { %2461 = vmatprep.mubr.msk.bf16.mxu1 %vm683_vm3, %v3130_v43  ;;  %v615_v55 = vshll.u32 %v3113_v36, 16  ;;  %v621_v58 = vshll.u32 %v3128_v42, 16  ;;  %2530 = vmatmul.mubr.msk.bf16.gmra.mrb[4].mxu0 %vm683_vm3, %v3130_v43  ;;  %v604_v59 = vor.u32 %v603_v6, %v599_v35  ;;  %v625_v5 = vshrl.u32 %v3128_v42, 16 }
  0x36   : > { %v1004_v60 = vsel %vm3079_vm7, %v1002_v44, %v1003_v2  ;;  %v614_v63 = vrot.slane %v612_v49, 4  ;;  %2543 = vmatprep.mubr.msk.bf16.mxu0 %vm683_vm3, %v3132_v46  ;;  %v600_v45 = vsel %vm2996_vm4, %v595_v50, %v599_v35  ;;  %v631_v19 = vshll.u32 %v3151_v54, 16 }
  0x37   : > { %v3175_v10 = vcombine.low %v1001_v53, %v1004_v60  ;;  %v617_v2 = vrot.slane %v615_v55, 5  ;;  %v623_v11 = vrot.slane %v621_v58, 5  ;;  %v605_v12 = vrot.slane %v604_v59, 4  ;;  %v3217_v58 = vld [vmem:[%s3583_s3 + $0xe] sm:$0x3] }
  0x38   : > { %v627_v15 = vrot.slane %v625_v5, 4  ;;  %v2277_v21 = vrot.slane %v3019_v56, 9  ;;  %v1007_v26 = vrot.slane %v3024_v61, 5  ;;  %v1010_v27 = vrot.slane %v3032_v4, 5 }
  0x39   : > { %v618_v24 = vor.u32 %v617_v2, %v614_v63  ;;  %v636_v18 = vshrl.u32 %v3163_v0, 16  ;;  %v610_v30 = vsel %vm2996_vm4, %v605_v12, %v609_v17  ;;  %v633_v35 = vrot.slane %v631_v19, 5 }
  0x3a   : > { %v628_v31 = vor.u32 %v627_v15, %v623_v11  ;;  %v639_v39 = vshll.u32 %v3163_v0, 16  ;;  %v3198_v40 = vcombine.low %v600_v45, %v610_v30  ;;  %v1008_v41 = vsel %vm3079_vm7, %v2277_v21, %v1007_v26 }
  0x3b   : > { %v619_v4 = vrot.slane %v618_v24, 4  ;;  %v1009_v47 = vrot.slane %v1007_v26, 4  ;;  %v638_v6 = vrot.slane %v636_v18, 4  ;;  %v645_v44 = vshll.u32 %v3183_v29, 16 }
  0x3c   : > { %v629_v48 = vrot.slane %v628_v31, 4  ;;  %v641_v17 = vrot.slane %v639_v39, 5  ;;  %2462 = vmatmul.mubr.msk.bf16.gmra.mrb[8].mxu1 %vm683_vm3, %v3198_v40  ;;  %v649_v53 = vshrl.u32 %v3183_v29, 16  ;;  %v655_v55 = vshll.u32 %v3189_v23, 16 }
  0x3d   : > { %v624_v49 = vsel %vm2996_vm4, %v619_v4, %v623_v11  ;;  %v1011_v50 = vsel %vm3079_vm7, %v1009_v47, %v1010_v27  ;;  %2544 = vmatmul.mubr.msk.bf16.vlgmr.msra.gmra.mrb[0].mxu0 %vm683_vm3, %v3175_v10  ;;  %v647_v5 = vrot.slane %v645_v44, 5  ;;  %v2278_v11 = vrot.slane %v3038_v13, 9 }
  0x3e   : > { %v634_v59 = vsel %vm2996_vm4, %v629_v48, %v633_v35  ;;  %v3223_v60 = vcombine.low %v1008_v41, %v1011_v50  ;;  %v642_v63 = vor.u32 %v641_v17, %v638_v6  ;;  %2560 = vmatpush3.bf16.msra.mxu0 %v3005_v38  ;;  %v651_v2 = vrot.slane %v649_v53, 4  ;;  %v3268_v53 = vld [vmem:[%s395_s21 + $0x4] sm:$0xf] }
  0x3f   : > { %v3227_v45 = vcombine.low %v624_v49, %v634_v59  ;;  %v1014_v15 = vrot.slane %v3050_v28, 5  ;;  %v1017_v19 = vrot.slane %v3057_v34, 5  ;;  %v2279_v21 = vrot.slane %v3070_v51, 9  ;;  %2751 = vmatprep.subr.msk.bf16.mxu0 %vm708_vm0, %v3217_v58 }
  0x40   : > { %2547 = vmatprep.mubr.msk.bf16.mxu0 %vm683_vm3, %v3223_v60  ;;  %v643_v12 = vrot.slane %v642_v63, 4  ;;  %v652_v38 = vor.u32 %v651_v2, %v647_v5  ;;  %v657_v24 = vrot.slane %v655_v55, 5  ;;  %v1021_v26 = vrot.slane %v3075_v57, 5 }
  0x41   : > { %2465 = vmatprep.mubr.msk.bf16.mxu1 %vm683_vm3, %v3227_v45  ;;  %v1024_v27 = vrot.slane %v3099_v20, 5  ;;  %v1015_v18 = vsel %vm3079_vm7, %v2278_v11, %v1014_v15  ;;  %v1016_v30 = vrot.slane %v1014_v15, 4  ;;  %v2258_v34 = vcombine.low %v2956_v7, %v2959_v8  ;;  %v3289_v15 = vld [vmem:[%s395_s21 + $0x8] sm:$0x1] }
  0x42   : > { %v1028_v31 = vrot.slane %v3128_v42, 5  ;;  %v648_v35 = vsel %vm2996_vm4, %v643_v12, %v647_v5  ;;  %v653_v20 = vrot.slane %v652_v38, 4  ;;  %v1022_v39 = vsel %vm3079_vm7, %v2279_v21, %v1021_v26  ;;  %v3279_v5 = vld [vmem:[%s395_s21] sm:$0xf]  ;;  %s2241_s21 = sshll.u32 %s420_s16, 3 }
  0x43   : > { %v1023_v4 = vrot.slane %v1021_v26, 4  ;;  %v1018_v41 = vsel %vm3079_vm7, %v1016_v30, %v1017_v19  ;;  %v2280_v47 = vrot.slane %v3113_v36, 9  ;;  %v1031_v6 = vrot.slane %v3151_v54, 5  ;;  %s3519_s28 = scalar_lea.vmem %s3586_s6, %s2241_s21 }
  0x44   : > { %v1030_v48 = vrot.slane %v1028_v31, 4  ;;  %v658_v17 = vsel %vm2996_vm4, %v653_v20, %v657_v24  ;;  %v3263_v44 = vcombine.low %v1015_v18, %v1018_v41  ;;  %v2281_v50 = vrot.slane %v3163_v0, 9  ;;  %v3315_v20 = vld [vmem:[%s409_s7 + $0x4] sm:$0xf] }
  0x45   : > { %v1025_v49 = vsel %vm3079_vm7, %v1023_v4, %v1024_v27  ;;  %v3271_v55 = vcombine.low %v648_v35, %v658_v17  ;;  %v1035_v63 = vrot.slane %v3183_v29, 5  ;;  %v1038_v54 = vrot.slane %v3189_v23, 5 }
  0x46   : > { %v3273_v59 = vcombine.low %v1022_v39, %v1025_v49  ;;  %2548 = vmatmul.mubr.msk.bf16.gmra.mrb[4].mxu0 %vm683_vm3, %v3263_v44  ;;  %v1029_v2 = vsel %vm3079_vm7, %v2280_v47, %v1028_v31  ;;  %v1032_v11 = vsel %vm3079_vm7, %v1030_v48, %v1031_v6  ;;  %v1477_v19 = vrot.slane %v3268_v53, 5  ;;  %v454_v6 = vld [vmem:[%s409_s7 + $0x8] sm:$0x1] }
  0x47   : > { %2466 = vmatmul.mubr.msk.bf16.gmra.mrb[12].mxu1 %vm683_vm3, %v3271_v55  ;;  %v1037_v12 = vrot.slane %v1035_v63, 4  ;;  %v1036_v23 = vsel %vm3079_vm7, %v2281_v50, %v1035_v63  ;;  %v989_v21 = vrot.slane %v2962_v9, 5  ;;  %v2316_v24 = vrot.slane %v3279_v5, 9 }
  0x48   : > { %2551 = vmatprep.mubr.msk.bf16.mxu0 %vm683_vm3, %v3273_v59  ;;  %2471 = vmatprep.mubr.msk.bf16.mxu1 %vm683_vm3, %v2258_v34  ;;  %v2274_v26 = vrot.slane %v2956_v7, 9  ;;  %v3303_v27 = vcombine.low %v1029_v2, %v1032_v11  ;;  %v1479_v18 = vrot.slane %v1477_v19, 4  ;;  %v1480_v30 = vrot.slane %v3289_v15, 5  ;;  %v3307_v34 = vld [vmem:[%s409_s7] sm:$0xf] }
  0x49   : > { %v1039_v38 = vsel %vm3079_vm7, %v1037_v12, %v1038_v54  ;;  %v986_v31 = vrot.slane %v2959_v8, 5  ;;  %v3311_v35 = vcombine.low %v2969_v14, %v2973_v16  ;;  %v1729_v39 = vshrl.u32 %v3307_v34, 16 }
  0x4a   : > { %v3313_v9 = vcombine.low %v1036_v23, %v1039_v38  ;;  %v1732_v7 = vshll.u32 %v3307_v34, 16  ;;  %v3321_v4 = vcombine.low %v2992_v32, %v3001_v37  ;;  %v1742_v47 = vshrl.u32 %v3315_v20, 16  ;;  %v458_v37 = vld [vmem:[%s3583_s3 + $0x6] sm:$0x3] }
  0x4b   : > { %v987_v8 = vsel %vm3079_vm7, %v2274_v26, %v986_v31  ;;  %v988_v41 = vrot.slane %v986_v31, 4  ;;  %v1089_v14 = vsel %vm708_vm0, %v3045_v22, 0  ;;  %v1478_v16 = vsel %vm3079_vm7, %v2316_v24, %v1477_v19 }
  0x4c   : > { %v1481_v48 = vsel %vm3079_vm7, %v1479_v18, %v1480_v30  ;;  %v1731_v17 = vrot.slane %v1729_v39, 4  ;;  %v1734_v49 = vrot.slane %v1732_v7, 5  ;;  %v1738_v63 = vshll.u32 %v3315_v20, 16 }
  0x4d   : > { %v990_v32 = vsel %vm3079_vm7, %v988_v41, %v989_v21  ;;  %v1744_v54 = vrot.slane %v1742_v47, 4  ;;  %v3346_v2 = vcombine.low %v1478_v16, %v1481_v48  ;;  %v1748_v11 = vshll.u32 %v454_v6, 16 }
  0x4e   : > { %2552 = vmatmul.mubr.msk.bf16.gmra.mrb[8].mxu0 %vm683_vm3, %v3303_v27  ;;  %v2282_v22 = vcombine.low %v987_v8, %v990_v32  ;;  %v1735_v50 = vor.u32 %v1734_v49, %v1731_v17  ;;  %v2344_v12 = vrot.slane %v3307_v34, 9  ;;  %v1740_v23 = vrot.slane %v1738_v63, 5 }
  0x4f   : > { %2472 = vmatmul.mubr.msk.bf16.vlgmr.msra.gmra.mrb[0].mxu1 %vm683_vm3, %v3311_v35  ;;  %2555 = vmatprep.mubr.msk.bf16.mxu0 %vm683_vm3, %v3313_v9  ;;  %v1877_v21 = vrot.slane %v3315_v20, 5  ;;  %v1880_v38 = vrot.slane %v454_v6, 5  ;;  %v3353_v24 = vcombine.low %v3019_v56, %v3024_v61  ;;  %v3357_v26 = vcombine.low %v3038_v13, %v3050_v28 }
  0x50   : > { %2488 = vmatpush3.bf16.msra.mxu1 %v1089_v14  ;;  %2475 = vmatprep.mubr.msk.bf16.mxu1 %vm683_vm3, %v3321_v4  ;;  %v1736_v19 = vrot.slane %v1735_v50, 4  ;;  %v1750_v18 = vrot.slane %v1748_v11, 5  ;;  %v1745_v31 = vor.u32 %v1744_v54, %v1740_v23  ;;  %v3383_v62 = vcombine.low %v3070_v51, %v3075_v57  ;;  %v463_v14 = vld [vmem:[%s3583_s3 + $0x10] sm:$0x3] }
  0x51   : > { %2746 = vmatprep.subr.msk.bf16.mxu1 %vm708_vm0, %v458_v37  ;;  %v3363_v39 = vsel %vm3079_vm7, %v2344_v12, %v1877_v21  ;;  %v1879_v7 = vrot.slane %v1877_v21, 4  ;;  %v1759_v41 = vsel %vm708_vm0, %v3217_v58, 0  ;;  %v3389_v47 = vcombine.low %v3113_v36, %v3128_v42 }
  0x52   : > { %v1741_v30 = vsel %vm2996_vm4, %v1736_v19, %v1740_v23  ;;  %v1746_v8 = vrot.slane %v1745_v31, 4  ;;  %v2265_v51 = vcombine.low %v3163_v0, %v3183_v29  ;;  %v2298_v57 = vcombine.low %v3279_v5, %v3268_v53 }
  0x53   : > { %v3369_v56 = vsel %vm3079_vm7, %v1879_v7, %v1880_v38  ;;  %v1213_v36 = vsel %vm708_vm0, %v458_v37, 0  ;;  %v2326_v42 = vcombine.low %v3307_v34, %v3315_v20  ;;  %v1332_v0 = vshll.u32 %v3279_v5, 16 }
  0x54   : > { %v2345_v61 = vcombine.low %v3363_v39, %v3369_v56  ;;  %v1751_v13 = vsel %vm2996_vm4, %v1746_v8, %v1750_v18  ;;  %v1342_v29 = vshrl.u32 %v3268_v53, 16  ;;  %v1889_v58 = vsel %vm708_vm0, %v463_v14, 0 }
  0x55   : > { %v2335_v28 = vcombine.low %v1741_v30, %v1751_v13  ;;  %v1334_v20 = vrot.slane %v1332_v0, 5 }
  0x56   : > { %2556 = vmatmul.mubr.msk.bf16.gmra.mrb[12].mxu0 %vm683_vm3, %v3346_v2  ;;  %v1344_v48 = vrot.slane %v1342_v29, 4 }
  0x57   : > { %2476 = vmatmul.mubr.msk.bf16.gmra.mrb[4].mxu1 %vm683_vm3, %v3353_v24  ;;  %2561 = vmatprep.mubr.msk.bf16.mxu0 %vm683_vm3, %v3321_v4 }
  0x58   : > { %2479 = vmatprep.mubr.msk.bf16.mxu1 %vm683_vm3, %v3357_v26 }
  0x5e   : > { %2562 = vmatmul.mubr.msk.bf16.vlgmr.msra.gmra.mrb[0].mxu0 %vm683_vm3, %v3353_v24 }
  0x5f   : > { %2480 = vmatmul.mubr.msk.bf16.gmra.mrb[8].mxu1 %vm683_vm3, %v3383_v62  ;;  %2578 = vmatpush3.bf16.msra.mxu0 %v1759_v41 }
  0x60   : > { %2483 = vmatprep.mubr.msk.bf16.mxu1 %vm683_vm3, %v3389_v47  ;;  %2565 = vmatprep.mubr.msk.bf16.mxu0 %vm683_vm3, %v3357_v26 }
  0x61   : > { %2752 = vmatprep.subr.msk.bf16.mxu0 %vm708_vm0, %v463_v14 }
  0x66   : > { %2566 = vmatmul.mubr.msk.bf16.gmra.mrb[4].mxu0 %vm683_vm3, %v3383_v62 }
  0x67   : > { %2484 = vmatmul.mubr.msk.bf16.gmra.mrb[12].mxu1 %vm683_vm3, %v2265_v51  ;;  %2569 = vmatprep.mubr.msk.bf16.mxu0 %vm683_vm3, %v3389_v47 }
  0x68   : > { %2489 = vmatprep.mubr.msk.bf16.mxu1 %vm683_vm3, %v2282_v22 }
  0x6e   : > { %2570 = vmatmul.mubr.msk.bf16.gmra.mrb[8].mxu0 %vm683_vm3, %v2265_v51 }
  0x6f   : > { %2490 = vmatmul.mubr.msk.bf16.vlgmr.msra.gmra.mrb[0].mxu1 %vm683_vm3, %v3132_v46  ;;  %2573 = vmatprep.mubr.msk.bf16.mxu0 %vm683_vm3, %v2298_v57  ;;  %v1329_v46 = vshrl.u32 %v3279_v5, 16  ;;  %v1348_v5 = vshll.u32 %v3289_v15, 16 }
  0x70   : > { %2506 = vmatpush3.bf16.msra.mxu1 %v1213_v36  ;;  %2493 = vmatprep.mubr.msk.bf16.mxu1 %vm683_vm3, %v3175_v10 }
  0x71   : > { %2748 = vmatprep.subr.msk.bf16.mxu1 %vm708_vm0, %v2918_v1  ;;  %v1338_v1 = vshll.u32 %v3268_v53, 16  ;;  %v1331_v34 = vrot.slane %v1329_v46, 4  ;;  %v1350_v6 = vrot.slane %v1348_v5, 5 }
  0x73   : > { %v1340_v16 = vrot.slane %v1338_v1, 5 }
  0x75   : > { %v1345_v53 = vor.u32 %v1344_v48, %v1340_v16 }
  0x76   : > { %2574 = vmatmul.mubr.msk.bf16.gmra.mrb[12].mxu0 %vm683_vm3, %v2326_v42 }
  0x77   : > { %2494 = vmatmul.mubr.msk.bf16.gmra.mrb[4].mxu1 %vm683_vm3, %v3223_v60  ;;  %2579 = vmatprep.mubr.msk.bf16.mxu0 %vm683_vm3, %v3072_v52  ;;  %v1335_v52 = vor.u32 %v1334_v20, %v1331_v34  ;;  %v1346_v37 = vrot.slane %v1345_v53, 4 }
  0x78   : > { %2497 = vmatprep.mubr.msk.bf16.mxu1 %vm683_vm3, %v3263_v44 }
  0x79   : > { %v1336_v32 = vrot.slane %v1335_v52, 4 }
  0x7e   : > { %2580 = vmatmul.mubr.msk.bf16.vlgmr.msra.gmra.mrb[0].mxu0 %vm683_vm3, %v3103_v25  ;;  %v1341_v25 = vsel %vm2996_vm4, %v1336_v32, %v1340_v16 }
  0x7f   : > { %2498 = vmatmul.mubr.msk.bf16.gmra.mrb[8].mxu1 %vm683_vm3, %v3273_v59  ;;  %2596 = vmatpush3.bf16.msra.mxu0 %v1889_v58 }
  0x80   : > { %2501 = vmatprep.mubr.msk.bf16.mxu1 %vm683_vm3, %v3303_v27  ;;  %2583 = vmatprep.mubr.msk.bf16.mxu0 %vm683_vm3, %v3130_v43  ;;  %v1351_v43 = vsel %vm2996_vm4, %v1346_v37, %v1350_v6 }
  0x81   : > { %v2307_v15 = vcombine.low %v1341_v25, %v1351_v43 }
  0x86   : > { %2584 = vmatmul.mubr.msk.bf16.gmra.mrb[4].mxu0 %vm683_vm3, %v3198_v40 }
  0x87   : > { %2502 = vmatmul.mubr.msk.bf16.gmra.mrb[12].mxu1 %vm683_vm3, %v3313_v9  ;;  %2587 = vmatprep.mubr.msk.bf16.mxu0 %vm683_vm3, %v3227_v45 }
  0x88   : > { %2507 = vmatprep.mubr.msk.bf16.mxu1 %vm683_vm3, %v3311_v35 }
  0x8e   : > { %2588 = vmatmul.mubr.msk.bf16.gmra.mrb[8].mxu0 %vm683_vm3, %v3271_v55 }
  0x8f   : > { %2508 = vmatmul.mubr.msk.bf16.vlgmr.msra.gmra.mrb[0].mxu1 %vm683_vm3, %v3321_v4  ;;  %2591 = vmatprep.mubr.msk.bf16.mxu0 %vm683_vm3, %v2307_v15  ;;  %v3510_v4 = vld [vmem:[%s3585_s5] ss:$0 sm:$0xff] }
  0x90   : > { %2614 = vmatpush3.bf16.msra.mxu1 %v2928_v3  ;;  %2511 = vmatprep.mubr.msk.bf16.mxu1 %vm683_vm3, %v3353_v24 }
  0x96   : > { %2592 = vmatmul.mubr.msk.bf16.gmra.mrb[12].mxu0 %vm683_vm3, %v2335_v28 }
  0x97   : > { %2512 = vmatmul.mubr.msk.bf16.gmra.mrb[4].mxu1 %vm683_vm3, %v3357_v26  ;;  %2597 = vmatprep.mubr.msk.bf16.mxu0 %vm683_vm3, %v3175_v10 }
  0x98   : > { %2515 = vmatprep.mubr.msk.bf16.mxu1 %vm683_vm3, %v3383_v62 }
  0x9e   : > { %2598 = vmatmul.mubr.msk.bf16.vlgmr.msra.gmra.mrb[0].mxu0 %vm683_vm3, %v3223_v60 }
  0x9f   : > { %2516 = vmatmul.mubr.msk.bf16.gmra.mrb[8].mxu1 %vm683_vm3, %v3389_v47  ;;  %2601 = vmatprep.mubr.msk.bf16.mxu0 %vm683_vm3, %v3263_v44 }
  0xa0   : > { %2519 = vmatprep.mubr.msk.bf16.mxu1 %vm683_vm3, %v2265_v51 }
  0xa6   : > { %2602 = vmatmul.mubr.msk.bf16.gmra.mrb[4].mxu0 %vm683_vm3, %v3273_v59 }
  0xa7   : > { %2520 = vmatmul.mubr.msk.bf16.gmra.mrb[12].mxu1 %vm683_vm3, %v2298_v57  ;;  %2605 = vmatprep.mubr.msk.bf16.mxu0 %vm683_vm3, %v3303_v27  ;;  %v3505_v27 = vld [vmem:[%s3584_s4] ss:$0 sm:$0xff] }
  0xa8   : > { %2533 = vmatprep.mubr.msk.bf16.mxu1 %vm683_vm3, %v3198_v40 }
  0xae   : > { %2606 = vmatmul.mubr.msk.bf16.gmra.mrb[8].mxu0 %vm683_vm3, %v3313_v9 }
  0xaf   : > { %2534 = vmatmul.mubr.msk.bf16.vlgmr.msra.gmra.mrb[8].mxu1 %vm683_vm3, %v3227_v45  ;;  %2609 = vmatprep.mubr.msk.bf16.mxu0 %vm683_vm3, %v3346_v2 }
  0xb0   : > { %2537 = vmatprep.mubr.msk.bf16.mxu1 %vm683_vm3, %v3271_v55 }
  0xb6   : > { %2610 = vmatmul.mubr.msk.bf16.gmra.mrb[12].mxu0 %vm683_vm3, %v2345_v61 }
  0xb7   : > { %2538 = vmatmul.mubr.msk.bf16.gmra.mrb[12].mxu1 %vm683_vm3, %v2307_v15 }
 0x162   : > { %v2509_v3 = vpop.f32.mrb[0].mxu1 }
 0x163   : > { %v1249_v33 = vpop.f32.mrb[1].mxu1 }
 0x164   : > { %v2510_v10 = vpop.f32.mrb[2].mxu1 }
 0x165   : > { %v1252_v40 = vpop.f32.mrb[3].mxu1 }
 0x16a   : > { %v2513_v60 = vpop.f32.mrb[4].mxu1 }
 0x16b   : > { %v1265_v45 = vpop.f32.mrb[5].mxu1 }
 0x16c   : > { %v2514_v44 = vpop.f32.mrb[6].mxu1 }
 0x16d   : > { %v1268_v59 = vpop.f32.mrb[7].mxu1 }
 0x171   : > { %v2599_v55 = vpop.f32.mrb[0].mxu0 }
 0x172   : > { %v2615_v35 = vadd.f32 %v2599_v55, %v2509_v3  ;;  %v1925_v9 = vpop.f32.mrb[1].mxu0 }
 0x173   : > { %v2616_v17 = vadd.f32 %v1925_v9, %v1249_v33  ;;  %v2600_v49 = vpop.f32.mrb[2].mxu0 }
 0x174   : > { %v2013_v22 = vmul.f32 %v2615_v35, %v3505_v27  ;;  %v2617_v50 = vadd.f32 %v2600_v49, %v2510_v10  ;;  %v1928_v63 = vpop.f32.mrb[3].mxu0 }
 0x175   : > { %v2011_v54 = vmul.f32 %v2616_v17, %v3505_v27  ;;  %v2618_v2 = vadd.f32 %v1928_v63, %v1252_v40 }
 0x176   : > { %v2036_v11 = vadd.f32 %v3510_v4, %v2013_v22  ;;  %v2014_v12 = vmul.f32 %v2617_v50, %v3505_v27 }
 0x177   : > { %v2034_v19 = vadd.f32 %v3510_v4, %v2011_v54  ;;  %v2012_v23 = vmul.f32 %v2618_v2, %v3505_v27 }
 0x178   : > { %v2052_v21 = vmax.f32 %v2036_v11, 0.0  ;;  %v2037_v38 = vadd.f32 %v3510_v4, %v2014_v12 }
 0x179   : > { %v2050_v24 = vmax.f32 %v2034_v19, 0.0  ;;  %v2035_v26 = vadd.f32 %v3510_v4, %v2012_v23  ;;  %v2603_v18 = vpop.f32.mrb[4].mxu0 }
 0x17a   : > { %2068 = vst [vmem:[%s3519_s28 + $0x10] sm:$0xff] %v2052_v21  ;;  %v2053_v30 = vmax.f32 %v2037_v38, 0.0  ;;  %v2619_v31 = vadd.f32 %v2603_v18, %v2513_v60  ;;  %v1941_v39 = vpop.f32.mrb[5].mxu0 }
 0x17b   : > { %2066 = vst [vmem:[%s3519_s28] sm:$0xff] %v2050_v24  ;;  %v2051_v7 = vmax.f32 %v2035_v26, 0.0  ;;  %v2620_v8 = vadd.f32 %v1941_v39, %v1265_v45  ;;  %v2604_v56 = vpop.f32.mrb[6].mxu0 }
 0x17c   : > { %2069 = vst [vmem:[%s3519_s28 + $0x18] sm:$0xff] %v2053_v30  ;;  %v2017_v61 = vmul.f32 %v2619_v31, %v3505_v27  ;;  %v2621_v13 = vadd.f32 %v2604_v56, %v2514_v44  ;;  %v1944_v28 = vpop.f32.mrb[7].mxu0 }
 0x17d   : > { %2067 = vst [vmem:[%s3519_s28 + $0x8] sm:$0xff] %v2051_v7  ;;  %v2015_v62 = vmul.f32 %v2620_v8, %v3505_v27  ;;  %v2622_v41 = vadd.f32 %v1944_v28, %v1268_v59 }
 0x17e   : > { %v2040_v47 = vadd.f32 %v3510_v4, %v2017_v61  ;;  %v2018_v14 = vmul.f32 %v2621_v13, %v3505_v27 }
 0x17f   : > { %v2038_v51 = vadd.f32 %v3510_v4, %v2015_v62  ;;  %v2016_v57 = vmul.f32 %v2622_v41, %v3505_v27 }
 0x180   : > { %v2056_v36 = vmax.f32 %v2040_v47, 0.0  ;;  %v2041_v42 = vadd.f32 %v3510_v4, %v2018_v14 }
 0x181   : > { %v2054_v46 = vmax.f32 %v2038_v51, 0.0  ;;  %v2039_v0 = vadd.f32 %v3510_v4, %v2016_v57  ;;  %v2607_v1 = vpop.f32.mrb[8].mxu0 }
 0x182   : > { %2072 = vst [vmem:[%s3519_s28 + $0x30] sm:$0xff] %v2056_v36  ;;  %v2057_v29 = vmax.f32 %v2041_v42, 0.0  ;;  %v2535_v58 = vpop.f32.mrb[8].mxu1  ;;  %v1957_v34 = vpop.f32.mrb[9].mxu0 }
 0x183   : > { %2070 = vst [vmem:[%s3519_s28 + $0x20] sm:$0xff] %v2054_v46  ;;  %v2055_v20 = vmax.f32 %v2039_v0, 0.0  ;;  %v2623_v16 = vadd.f32 %v2607_v1, %v2535_v58  ;;  %v1427_v48 = vpop.f32.mrb[9].mxu1  ;;  %v2608_v52 = vpop.f32.mrb[10].mxu0 }
 0x184   : > { %2073 = vst [vmem:[%s3519_s28 + $0x38] sm:$0xff] %v2057_v29  ;;  %v2624_v53 = vadd.f32 %v1957_v34, %v1427_v48  ;;  %v2536_v5 = vpop.f32.mrb[10].mxu1  ;;  %v1960_v32 = vpop.f32.mrb[11].mxu0 }
 0x185   : > { %2071 = vst [vmem:[%s3519_s28 + $0x28] sm:$0xff] %v2055_v20  ;;  %v2021_v37 = vmul.f32 %v2623_v16, %v3505_v27  ;;  %v2625_v6 = vadd.f32 %v2608_v52, %v2536_v5  ;;  %v1430_v25 = vpop.f32.mrb[11].mxu1 }
 0x186   : > { %v2019_v43 = vmul.f32 %v2624_v53, %v3505_v27  ;;  %v2626_v15 = vadd.f32 %v1960_v32, %v1430_v25 }
 0x187   : > { %v2044_v3 = vadd.f32 %v3510_v4, %v2021_v37  ;;  %v2022_v33 = vmul.f32 %v2625_v6, %v3505_v27 }
 0x188   : > { %v2042_v10 = vadd.f32 %v3510_v4, %v2019_v43  ;;  %v2020_v40 = vmul.f32 %v2626_v15, %v3505_v27 }
 0x189   : > { %v2060_v60 = vmax.f32 %v2044_v3, 0.0  ;;  %v2045_v45 = vadd.f32 %v3510_v4, %v2022_v33  ;;  %v2611_v44 = vpop.f32.mrb[12].mxu0 }
 0x18a   : > { %v2058_v59 = vmax.f32 %v2042_v10, 0.0  ;;  %v2043_v55 = vadd.f32 %v3510_v4, %v2020_v40  ;;  %v2539_v35 = vpop.f32.mrb[12].mxu1  ;;  %v1973_v9 = vpop.f32.mrb[13].mxu0 }
 0x18b   : > { %2076 = vst [vmem:[%s3519_s28 + $0x50] sm:$0xff] %v2060_v60  ;;  %v2061_v17 = vmax.f32 %v2045_v45, 0.0  ;;  %v2627_v49 = vadd.f32 %v2611_v44, %v2539_v35  ;;  %v1443_v22 = vpop.f32.mrb[13].mxu1  ;;  %v2612_v50 = vpop.f32.mrb[14].mxu0 }
 0x18c   : > { %2074 = vst [vmem:[%s3519_s28 + $0x40] sm:$0xff] %v2058_v59  ;;  %v2059_v63 = vmax.f32 %v2043_v55, 0.0  ;;  %v2628_v54 = vadd.f32 %v1973_v9, %v1443_v22  ;;  %v2540_v2 = vpop.f32.mrb[14].mxu1  ;;  %v1976_v11 = vpop.f32.mrb[15].mxu0 }
 0x18d   : > { %2077 = vst [vmem:[%s3519_s28 + $0x58] sm:$0xff] %v2061_v17  ;;  %v2025_v12 = vmul.f32 %v2627_v49, %v3505_v27  ;;  %v2629_v19 = vadd.f32 %v2612_v50, %v2540_v2  ;;  %v1446_v23 = vpop.f32.mrb[15].mxu1 }
 0x18e   : > { %2075 = vst [vmem:[%s3519_s28 + $0x48] sm:$0xff] %v2059_v63  ;;  %v2023_v21 = vmul.f32 %v2628_v54, %v3505_v27  ;;  %v2630_v38 = vadd.f32 %v1976_v11, %v1446_v23 }
 0x18f   : > { %v2048_v24 = vadd.f32 %v3510_v4, %v2025_v12  ;;  %v2026_v26 = vmul.f32 %v2629_v19, %v3505_v27 }
 0x190   : > { %v2046_v18 = vadd.f32 %v3510_v4, %v2023_v21  ;;  %v2024_v30 = vmul.f32 %v2630_v38, %v3505_v27 }
 0x191   : > { %v2064_v31 = vmax.f32 %v2048_v24, 0.0  ;;  %v2049_v39 = vadd.f32 %v3510_v4, %v2026_v26 }
 0x192   : > { %v2062_v7 = vmax.f32 %v2046_v18, 0.0  ;;  %v2047_v8 = vadd.f32 %v3510_v4, %v2024_v30 }
 0x193   : > { %2080 = vst [vmem:[%s3519_s28 + $0x70] sm:$0xff] %v2064_v31  ;;  %v2065_v56 = vmax.f32 %v2049_v39, 0.0 }
 0x194   : > { %2078 = vst [vmem:[%s3519_s28 + $0x60] sm:$0xff] %v2062_v7  ;;  %v2063_v61 = vmax.f32 %v2047_v8, 0.0 }
 0x195   : > { %2081 = vst [vmem:[%s3519_s28 + $0x78] sm:$0xff] %v2065_v56 }
 0x196   : > { %2079 = vst [vmem:[%s3519_s28 + $0x68] sm:$0xff] %v2063_v61 }
 0x197 PF: > { %s16_s25 = sadd.s32 1, %s2845_s25   ;;  %s3592_s21 = smov %s2837_s23 }
 0x198   : > { %p13_p10 = scmp.ge.s32.totalorder %s16_s25, 6   ;;  %s3593_s22 = smov %s2841_s24 }
 0x199   : > { %s3594_s23 = smov %s3597_s26  ;;  %s3595_s24 = smov %s3601_s27 }
 0x19a   :  { %15 = sbr.rel (!%p13_p10) target bundleno = 3 (0x3), region = 80 }

</bundles_post_ra>
